<compile_context>
chip_gen: v7x
topology: tpu7x:2x2x1
jax: 0.10.0
libtpu: 0.0.40
codegen_flags: <defaults>
</compile_context>

<pallas_src>
from functools import partial

import jax
import jax.numpy as jnp
from jax.experimental import pallas as pl
from jax.experimental.pallas import tpu as pltpu


def _round_up(x, m):
    return ((x + m - 1) // m) * m


def _cdiv(a, b):
    return (a + b - 1) // b


def _group_mlp_kernel(x_ref, w1_ref, w2_ref, gamma_ref, beta_ref, o_ref, *, eps):
    # x_ref:  (tm, din) tile for this (group, row-tile)     -- input dtype
    # w1_ref: (din, dout), w2_ref: (dout, din)              -- resident per group (bf16)
    # gamma_ref / beta_ref: (1, din)                        -- resident for whole call
    x = x_ref[...]
    x_f32 = x.astype(jnp.float32)

    # ---- per-group MLP (bias-free, matching the PyTorch module): relu(x @ w1) @ w2 ----
    h = jnp.dot(x.astype(w1_ref.dtype), w1_ref[...],
                preferred_element_type=jnp.float32)
    h = jnp.maximum(h, 0.0)
    y = jnp.dot(h.astype(w2_ref.dtype), w2_ref[...],
                preferred_element_type=jnp.float32)

    # TODO(synk): nn.Dropout omitted (inference / eval mode). Training-mode dropout
    # would use pltpu.prng_seed + pltpu.prng_random_bits here.

    # ---- residual + LayerNorm over din (f32), via E[z^2] - E[z]^2 ----
    z = y + x_f32
    inv_d = 1.0 / z.shape[-1]
    mean = jnp.sum(z, axis=-1, keepdims=True) * inv_d
    mean_sq = jnp.sum(z * z, axis=-1, keepdims=True) * inv_d
    var = mean_sq - mean * mean
    inv = jax.lax.rsqrt(var + eps)
    gamma = gamma_ref[...].astype(jnp.float32)
    beta = beta_ref[...].astype(jnp.float32)
    o_ref[...] = ((z - mean) * (inv * gamma) + beta).astype(o_ref.dtype)


def _derive_tile(T, din, dout, x_itemsize, w_itemsize, sub, tm_max, vmem_budget):
    """Balanced row tile that fits a conservative VMEM budget."""
    def bytes_needed(t):
        tiles = 2 * 2 * t * din * x_itemsize           # x + out, double-buffered
        weights = 2 * din * dout * w_itemsize          # w1 + w2, single-buffered
        temps = 4 * t * max(din, dout) * 4             # f32 temporaries (h, z, ...)
        return tiles + weights + temps + 4 * din * 4   # + gamma/beta

    # Balanced tiling: minimizes padding when T is slightly above tm_max.
    n_tiles = max(1, _cdiv(T, tm_max))
    tm = _round_up(_cdiv(T, n_tiles), sub)
    while tm > sub and bytes_needed(tm) > vmem_budget:
        tm -= sub
    tm = max(tm, sub)
    return tm, bytes_needed(tm)


def group_mlp(x, w1, w2, gamma, beta, *, eps=1e-5, tm_max=512,
              matmul_dtype=jnp.bfloat16, x_is_group_major=False):
    """x: (T, nb, din) (or (nb, T, din) if x_is_group_major);
    w1: (nb, din, dout); w2: (nb, dout, din); gamma, beta: (din,).
    Returns the same layout as the input."""
    if x_is_group_major:
        nb, T, din = x.shape
        xg = x
    else:
        T, nb, din = x.shape
        # Group-major layout so each grid step sees a contiguous (tm, din) tile.
        xg = jnp.transpose(x, (1, 0, 2))  # (nb, T, din)
    dout = w1.shape[-1]
    assert w1.shape == (nb, din, dout), w1.shape
    assert w2.shape == (nb, dout, din), w2.shape
    assert gamma.shape == (din,) and beta.shape == (din,)

    # bf16 MXU operands (f32 accumulation is kept via preferred_element_type).
    if matmul_dtype is not None:
        w1 = w1.astype(matmul_dtype)
        w2 = w2.astype(matmul_dtype)

    x_itemsize = jnp.dtype(x.dtype).itemsize
    w_itemsize = jnp.dtype(w1.dtype).itemsize
    sub = 8 * 4 // x_itemsize                      # dtype-aware sublane rounding

    vmem_budget = 40 << 20                         # conservative: fits v7x's 64 MiB
    tm, vmem_needed = _derive_tile(T, din, dout, x_itemsize, w_itemsize,
                                   sub, tm_max, vmem_budget)
    t_pad = _round_up(T, tm)
    if t_pad != T:
        xg = jnp.pad(xg, ((0, 0), (0, t_pad - T), (0, 0)))

    grid = (nb, t_pad // tm)  # row axis innermost -> per-group weights stay resident

    gamma2 = gamma.reshape(1, din)
    beta2 = beta.reshape(1, din)

    cost = pl.CostEstimate(
        flops=4 * nb * t_pad * din * dout + 8 * nb * t_pad * din,  # 2 matmuls + LN/residual
        transcendentals=nb * t_pad,                                # one rsqrt per row
        bytes_accessed=(2 * nb * t_pad * din * x_itemsize          # x read + out write
                        + 2 * nb * din * dout * w_itemsize         # w1 + w2
                        + 2 * din * 4),                            # gamma + beta
    )

    vmem_limit = min(_round_up(int(1.25 * vmem_needed), 1 << 20) + (2 << 20), 56 << 20)

    out = pl.pallas_call(
        partial(_group_mlp_kernel, eps=eps),
        out_shape=jax.ShapeDtypeStruct((nb, t_pad, din), x.dtype),
        grid_spec=pltpu.PrefetchScalarGridSpec(
            num_scalar_prefetch=0,
            grid=grid,
            in_specs=[
                pl.BlockSpec((pl.Squeezed(), tm, din), lambda g, i: (g, i, 0)),
                # Weights change once per group -> single-buffer them to halve
                # their VMEM footprint (one un-hidden DMA per group boundary).
                pl.BlockSpec((pl.Squeezed(), din, dout), lambda g, i: (g, 0, 0),
                             pipeline_mode=pl.Buffered(1)),
                pl.BlockSpec((pl.Squeezed(), dout, din), lambda g, i: (g, 0, 0),
                             pipeline_mode=pl.Buffered(1)),
                pl.BlockSpec((1, din), lambda g, i: (0, 0)),
                pl.BlockSpec((1, din), lambda g, i: (0, 0)),
            ],
            out_specs=pl.BlockSpec((pl.Squeezed(), tm, din), lambda g, i: (g, i, 0)),
        ),
        compiler_params=pltpu.CompilerParams(
            # Groups (and row tiles) are fully independent: both axes parallel so
            # v7x's 2 TensorCores split groups (no effect on single-TC v5e/v6e).
            dimension_semantics=("parallel", "parallel"),
            vmem_limit_bytes=vmem_limit,
        ),
        cost_estimate=cost,
    )(xg, w1, w2, gamma2, beta2)

    out = out[:, :T, :]                       # drop row padding
    if x_is_group_major:
        return out                             # (nb, T, din)
    return jnp.transpose(out, (1, 0, 2))       # back to (T, nb, din)


if __name__ == "__main__":
    # Small shapes consistent with the module: x is (seq, nb, din).
    T, nb, din, dout = 16, 4, 128, 256
    eps = 1e-5

    key = jax.random.PRNGKey(0)
    kx, k1, k2 = jax.random.split(key, 3)

    x = jax.random.normal(kx, (T, nb, din), dtype=jnp.float32)
    w1 = 0.01 * jax.random.normal(k1, (nb, din, dout), dtype=jnp.float32)
    w2 = 0.01 * jax.random.normal(k2, (nb, dout, din), dtype=jnp.float32)
    gamma = jnp.ones((din,), dtype=jnp.float32)   # LayerNorm default init
    beta = jnp.zeros((din,), dtype=jnp.float32)

    out = jax.jit(group_mlp)(x, w1, w2, gamma, beta)
    out = jax.block_until_ready(out)

    # Pure-JAX f32 reference (mirrors the PyTorch forward, dropout = identity).
    xr = jnp.transpose(x, (1, 0, 2))                                  # (nb, T, din)
    h = jnp.maximum(jnp.einsum("gtd,gdh->gth", xr, w1,
                               preferred_element_type=jnp.float32), 0.0)
    y = jnp.einsum("gth,ghd->gtd", h, w2, preferred_element_type=jnp.float32)
    y = jnp.transpose(y, (1, 0, 2))                                   # (T, nb, din)
    z = y + x
    mean = z.mean(-1, keepdims=True)
    var = ((z - mean) ** 2).mean(-1, keepdims=True)
    ref = (z - mean) / jnp.sqrt(var + eps) * gamma + beta

    assert out.shape == (T, nb, din)
    # bf16 matmul operands vs f32 reference -> modest tolerance.
    assert jnp.allclose(out, ref, atol=5e-3, rtol=5e-3), float(
        jnp.max(jnp.abs(out - ref)))
    print("KERNEL_OK")
</pallas_src>

<mosaic_0001>
module attributes {stable_mosaic.version = 11 : i64} {
  func.func @_group_mlp_kernel(%arg0: i32, %arg1: i32, %arg2: memref<1x16x128xf32, #tpu.memory_space<vmem>>, %arg3: memref<1x128x256xbf16, #tpu.memory_space<vmem>>, %arg4: memref<1x256x128xbf16, #tpu.memory_space<vmem>>, %arg5: memref<1x128xf32, #tpu.memory_space<vmem>>, %arg6: memref<1x128xf32, #tpu.memory_space<vmem>>, %arg7: memref<1x16x128xf32, #tpu.memory_space<vmem>>) attributes {dimension_semantics = [#tpu.dimension_semantics<parallel>, #tpu.dimension_semantics<parallel>], iteration_bounds = array<i64: 4, 1>, scalar_prefetch = 0 : i64, scratch_operands = 0 : i64, tpu.core_type = #tpu.core_type<tc>, window_params = [{transform_indices = @transform_0, window_bounds = array<i64: 1, 16, 128>}, {pipeline_mode = #tpu.pipeline_mode<synchronous>, transform_indices = @transform_1, window_bounds = array<i64: 1, 128, 256>}, {pipeline_mode = #tpu.pipeline_mode<synchronous>, transform_indices = @transform_2, window_bounds = array<i64: 1, 256, 128>}, {pipeline_mode = #tpu.pipeline_mode<synchronous>, transform_indices = @transform_3, window_bounds = array<i64: 1, 128>}, {pipeline_mode = #tpu.pipeline_mode<synchronous>, transform_indices = @transform_4, window_bounds = array<i64: 1, 128>}, {transform_indices = @transform_5, window_bounds = array<i64: 1, 16, 128>}]} {
    %c0 = arith.constant 0 : index
    %c0_0 = arith.constant 0 : index
    %c0_1 = arith.constant 0 : index
    %0 = vector.load %arg2[%c0, %c0_0, %c0_1] : memref<1x16x128xf32, #tpu.memory_space<vmem>>, vector<1x16x128xf32>
    %1 = vector.shape_cast %0 : vector<1x16x128xf32> to vector<16x128xf32>
    %2 = arith.truncf %1 : vector<16x128xf32> to vector<16x128xbf16>
    %c0_2 = arith.constant 0 : index
    %c0_3 = arith.constant 0 : index
    %c0_4 = arith.constant 0 : index
    %3 = vector.load %arg3[%c0_2, %c0_3, %c0_4] : memref<1x128x256xbf16, #tpu.memory_space<vmem>>, vector<1x128x256xbf16>
    %4 = vector.shape_cast %3 : vector<1x128x256xbf16> to vector<128x256xbf16>
    %cst = arith.constant dense<0.000000e+00> : vector<16x256xf32>
    %5 = tpu.matmul %2, %4, %cst {dimension_numbers = #tpu.dot_dimension_numbers<[1], [0], [0], [1], [0, 0, 1, 1], [], []>} : vector<16x128xbf16>, vector<128x256xbf16>, vector<16x256xf32> -> vector<16x256xf32>
    %cst_5 = arith.constant 0.000000e+00 : f32
    %6 = vector.broadcast %cst_5 : f32 to vector<16x256xf32>
    %7 = arith.maximumf %5, %6 : vector<16x256xf32>
    %8 = arith.truncf %7 : vector<16x256xf32> to vector<16x256xbf16>
    %c0_6 = arith.constant 0 : index
    %c0_7 = arith.constant 0 : index
    %c0_8 = arith.constant 0 : index
    %9 = vector.load %arg4[%c0_6, %c0_7, %c0_8] : memref<1x256x128xbf16, #tpu.memory_space<vmem>>, vector<1x256x128xbf16>
    %10 = vector.shape_cast %9 : vector<1x256x128xbf16> to vector<256x128xbf16>
    %cst_9 = arith.constant dense<0.000000e+00> : vector<16x128xf32>
    %11 = tpu.matmul %8, %10, %cst_9 {dimension_numbers = #tpu.dot_dimension_numbers<[1], [0], [0], [1], [0, 0, 1, 1], [], []>} : vector<16x256xbf16>, vector<256x128xbf16>, vector<16x128xf32> -> vector<16x128xf32>
    %12 = arith.addf %11, %1 : vector<16x128xf32>
    %cst_10 = arith.constant dense<0.000000e+00> : vector<16xf32>
    %13 = vector.multi_reduction <add>, %12, %cst_10 [1] : vector<16x128xf32> to vector<16xf32>
    %14 = vector.shape_cast %13 : vector<16xf32> to vector<16x1xf32>
    %cst_11 = arith.constant 7.812500e-03 : f32
    %15 = vector.broadcast %cst_11 : f32 to vector<16x1xf32>
    %16 = arith.mulf %14, %15 : vector<16x1xf32>
    %17 = arith.mulf %12, %12 : vector<16x128xf32>
    %cst_12 = arith.constant dense<0.000000e+00> : vector<16xf32>
    %18 = vector.multi_reduction <add>, %17, %cst_12 [1] : vector<16x128xf32> to vector<16xf32>
    %19 = vector.shape_cast %18 : vector<16xf32> to vector<16x1xf32>
    %cst_13 = arith.constant 7.812500e-03 : f32
    %20 = vector.broadcast %cst_13 : f32 to vector<16x1xf32>
    %21 = arith.mulf %19, %20 : vector<16x1xf32>
    %22 = arith.mulf %16, %16 : vector<16x1xf32>
    %23 = arith.subf %21, %22 : vector<16x1xf32>
    %cst_14 = arith.constant 9.99999974E-6 : f32
    %24 = vector.broadcast %cst_14 : f32 to vector<16x1xf32>
    %25 = arith.addf %23, %24 : vector<16x1xf32>
    %26 = math.rsqrt %25 : vector<16x1xf32>
    %c0_15 = arith.constant 0 : index
    %c0_16 = arith.constant 0 : index
    %27 = vector.load %arg5[%c0_15, %c0_16] : memref<1x128xf32, #tpu.memory_space<vmem>>, vector<1x128xf32>
    %c0_17 = arith.constant 0 : index
    %c0_18 = arith.constant 0 : index
    %28 = vector.load %arg6[%c0_17, %c0_18] : memref<1x128xf32, #tpu.memory_space<vmem>>, vector<1x128xf32>
    %29 = vector.broadcast %16 : vector<16x1xf32> to vector<16x128xf32>
    %30 = arith.subf %12, %29 : vector<16x128xf32>
    %31 = vector.broadcast %26 : vector<16x1xf32> to vector<16x128xf32>
    %32 = vector.broadcast %27 : vector<1x128xf32> to vector<16x128xf32>
    %33 = arith.mulf %31, %32 : vector<16x128xf32>
    %34 = arith.mulf %30, %33 : vector<16x128xf32>
    %35 = vector.broadcast %28 : vector<1x128xf32> to vector<16x128xf32>
    %36 = arith.addf %34, %35 : vector<16x128xf32>
    %c0_19 = arith.constant 0 : index
    %c0_20 = arith.constant 0 : index
    %c0_21 = arith.constant 0 : index
    %37 = vector.load %arg7[%c0_19, %c0_20, %c0_21] : memref<1x16x128xf32, #tpu.memory_space<vmem>>, vector<1x16x128xf32>
    %38 = vector.shape_cast %37 : vector<1x16x128xf32> to vector<16x128xf32>
    %39 = vector.shape_cast %36 : vector<16x128xf32> to vector<1x16x128xf32>
    tpu.vector_store %arg7[%c0_19, %c0_20, %c0_21], %39 {strides = array<i32>} : memref<1x16x128xf32, #tpu.memory_space<vmem>>, vector<1x16x128xf32>,
    return
  }
  func.func @transform_0(%arg0: i32, %arg1: i32) -> (i32, i32, i32) {
    %c0_i32 = arith.constant 0 : i32
    %c0_i32_0 = arith.constant 0 : i32
    return %arg0, %arg1, %c0_i32 : i32, i32, i32
  }
  func.func @transform_1(%arg0: i32, %arg1: i32) -> (i32, i32, i32) {
    %c0_i32 = arith.constant 0 : i32
    %c0_i32_0 = arith.constant 0 : i32
    %c0_i32_1 = arith.constant 0 : i32
    return %arg0, %c0_i32, %c0_i32_0 : i32, i32, i32
  }
  func.func @transform_2(%arg0: i32, %arg1: i32) -> (i32, i32, i32) {
    %c0_i32 = arith.constant 0 : i32
    %c0_i32_0 = arith.constant 0 : i32
    %c0_i32_1 = arith.constant 0 : i32
    return %arg0, %c0_i32, %c0_i32_0 : i32, i32, i32
  }
  func.func @transform_3(%arg0: i32, %arg1: i32) -> (i32, i32) {
    %c0_i32 = arith.constant 0 : i32
    %c0_i32_0 = arith.constant 0 : i32
    %c0_i32_1 = arith.constant 0 : i32
    return %c0_i32, %c0_i32_0 : i32, i32
  }
  func.func @transform_4(%arg0: i32, %arg1: i32) -> (i32, i32) {
    %c0_i32 = arith.constant 0 : i32
    %c0_i32_0 = arith.constant 0 : i32
    %c0_i32_1 = arith.constant 0 : i32
    return %c0_i32, %c0_i32_0 : i32, i32
  }
  func.func @transform_5(%arg0: i32, %arg1: i32) -> (i32, i32, i32) {
    %c0_i32 = arith.constant 0 : i32
    %c0_i32_0 = arith.constant 0 : i32
    return %arg0, %arg1, %c0_i32 : i32, i32, i32
  }
}

</mosaic_0001>

<bundles_post_ra>
// kernel: group_mlp.1
= control target key start
LH: loop header
LB: loop body
LE: loop exit
PB: predicated region body
PF: predicated region fallthrough
CT: control target
= control target key end

     0   :  { %s984_s18 = smov 0   ;;  %s986_s19 = smov 0   ;;  %s1073_s0 = inlined_call_operand.vmem [shape: f32[4,16,128], index: 0, kind: input, shape index: {}]   ;;  %s1074_s1 = inlined_call_operand.vmem [shape: bf16[4,128,256], index: 1, kind: input, shape index: {}]   ;;  %s1075_s2 = inlined_call_operand.vmem [shape: bf16[4,256,128], index: 2, kind: input, shape index: {}]   ;;  %s1076_s3 = inlined_call_operand.vmem [shape: f32[1,128], index: 3, kind: input, shape index: {}]   ;;  %s1077_s4 = inlined_call_operand.vmem [shape: f32[1,128], index: 4, kind: input, shape index: {}]   ;;  %s1078_s5 = inlined_call_operand.vmem [shape: f32[4,16,128], index: 5, kind: output, shape index: {}]  }
   0x1   :  { %s988_s20 = smov 0  }
   0x2 LB: > { %s27_s21 = sadd.s32 1, %s947_s19  ;;  %p789_p0 = scmp.ge.s32.totalorder %s951_s20, 1  ;;  %s951_s20 = sphi %s988_s20, %s15_s20   ;;  %s947_s19 = sphi %s986_s19, %s1080_s19   ;;  %s943_s18 = sphi %s984_s18, %s1079_s18  }
   0x3   : > { %p29_p1 = scmp.ge.s32.totalorder %s27_s21, 4  ;;  %p228_p2 = scmp.lt.s32.totalorder %s951_s20, 5 }
   0x5   : > { %s1082_s21 = smov (%p29_p1, %s27_s21), 0  ;;  %p229_p3 = pnand %p789_p0, %p228_p2 }
   0x6   : > { %p275_p4 = scmp.lt.s32.totalorder (!%p229_p3), %s943_s18, 3  ;;  %v953_v0 = vmov (!%p229_p3), 0  }
   0x7   : > { %232 = sbr.rel (%p229_p3) target bundleno = 659 (0x293), region = 40  ;;  %436 = vmatprep.mubr.bf16.mxu0 (!%p229_p3), %v953_v0 }
   0xe   : > { %s1084_s18 = smov (!%p275_p4, %s943_s18), 3 }
   0xf   : > { %s835_s22 = sshll.u32 %s1084_s18, 7  ;;  %s834_s29 = sshll.u32 %s1084_s18, 4 }
  0x10   : > { %s1008_s25 = scalar_lea.vmem %s1074_s1, %s835_s22  ;;  %s1020_s28 = scalar_lea.vmem %s1075_s2, %s835_s22 }
  0x11   : > { %v885_v1 = vld [vmem:[%s1008_s25 + $0x4] ss:$8 sps:$4 sm:$0xff]   ;;  %v887_v2 = vld [vmem:[%s1008_s25] ss:$8 sps:$4 sm:$0xff]   ;;  %v888_v3 = vld [vmem:[%s1008_s25 + $0x14] ss:$8 sps:$4 sm:$0xff]   ;;  %s282_s7 = scalar_lea.vmem %s1073_s0, %s834_s29  ;;  %s302_s14 = scalar_lea.vmem %s1078_s5, %s834_s29 }
  0x12   : > { %404 = vmatprep.subr.bf16.mxu0 %v885_v1  ;;  %v890_v4 = vld [vmem:[%s1008_s25 + $0x10] ss:$8 sps:$4 sm:$0xff]   ;;  %v891_v5 = vld [vmem:[%s1008_s25 + $0x24] ss:$8 sps:$4 sm:$0xff]   ;;  %v893_v6 = vld [vmem:[%s1008_s25 + $0x20] ss:$8 sps:$4 sm:$0xff]  }
  0x13   : > { %405 = vmatpush1.bf16.msra.mxu0 %v887_v2  ;;  %v894_v7 = vld [vmem:[%s1008_s25 + $0x34] ss:$8 sps:$4 sm:$0xff]   ;;  %v896_v8 = vld [vmem:[%s1008_s25 + $0x30] ss:$8 sps:$4 sm:$0xff]   ;;  %v897_v9 = vld [vmem:[%s1008_s25 + $0x44] ss:$8 sps:$4 sm:$0xff]  }
  0x14   : > { %406 = vmatprep.subr.bf16.mxu0 %v888_v3  ;;  %v909_v10 = vld [vmem:[%s1020_s28 + $0x40] sm:$0xff]   ;;  %v900_v13 = vld [vmem:[%s1008_s25 + $0x54] ss:$8 sps:$4 sm:$0xff]   ;;  %v911_v14 = vld [vmem:[%s1020_s28 + $0x48] sm:$0xff]  }
  0x15   : > { %v899_v11 = vld [vmem:[%s1008_s25 + $0x40] ss:$8 sps:$4 sm:$0xff]   ;;  %838 = vmatprep.subr.bf16.mxu1 %v909_v10  ;;  %v913_v16 = vld [vmem:[%s1020_s28 + $0x50] sm:$0xff]   ;;  %v903_v18 = vld [vmem:[%s1008_s25 + $0x64] ss:$8 sps:$4 sm:$0xff]  }
  0x16   : > { %v910_v12 = vld [vmem:[%s1020_s28] sm:$0xff]   ;;  %v912_v15 = vld [vmem:[%s1020_s28 + $0x8] sm:$0xff]   ;;  %v902_v17 = vld [vmem:[%s1008_s25 + $0x50] ss:$8 sps:$4 sm:$0xff]  }
  0x17   : > { %407 = vmatpush1.bf16.msra.mxu0 %v890_v4  ;;  %839 = vmatpush3.bf16.msra.mxu1 %v910_v12  ;;  %v914_v19 = vld [vmem:[%s1020_s28 + $0x10] sm:$0xff]   ;;  %v915_v20 = vld [vmem:[%s1020_s28 + $0x58] sm:$0xff]   ;;  %v905_v21 = vld [vmem:[%s1008_s25 + $0x60] ss:$8 sps:$4 sm:$0xff]  }
  0x18   : > { %408 = vmatprep.subr.bf16.mxu0 %v891_v5  ;;  %840 = vmatprep.subr.bf16.mxu1 %v911_v14  ;;  %v906_v22 = vld [vmem:[%s1008_s25 + $0x74] ss:$8 sps:$4 sm:$0xff]   ;;  %v917_v24 = vld [vmem:[%s1020_s28 + $0x60] sm:$0xff]   ;;  %v908_v25 = vld [vmem:[%s1008_s25 + $0x70] ss:$8 sps:$4 sm:$0xff]  }
  0x19   : > { %v916_v23 = vld [vmem:[%s1020_s28 + $0x18] sm:$0xff]   ;;  %v305_v26 = vld [vmem:[%s282_s7] sm:$0xff]  ;;  %v306_v27 = vld [vmem:[%s282_s7 + $0x8] sm:$0xff] }
  0x1a   : > { %v918_v28 = vld [vmem:[%s1020_s28 + $0x20] sm:$0xff]   ;;  %v919_v29 = vld [vmem:[%s1020_s28 + $0x68] sm:$0xff]   ;;  %v307_v30 = vpack.c.bf16 %v306_v27, %v305_v26  ;;  %v921_v32 = vld [vmem:[%s1020_s28 + $0x70] sm:$0xff]  }
  0x1b   : > { %409 = vmatpush1.bf16.msra.mxu0 %v893_v6  ;;  %841 = vmatpush3.bf16.msra.mxu1 %v912_v15  ;;  %v920_v31 = vld [vmem:[%s1020_s28 + $0x28] sm:$0xff]   ;;  %v922_v33 = vld [vmem:[%s1020_s28 + $0x30] sm:$0xff]   ;;  %v923_v34 = vld [vmem:[%s1020_s28 + $0x78] sm:$0xff]  }
  0x1c   : > { %410 = vmatprep.subr.bf16.mxu0 %v894_v7  ;;  %842 = vmatprep.subr.bf16.mxu1 %v913_v16  ;;  %v924_v35 = vld [vmem:[%s1020_s28 + $0x38] sm:$0xff]   ;;  %v830_v6 = vld [vmem:[%s1076_s3] ss:$0 sm:$0xff] }
  0x1d   : > { %v831_v10 = vld [vmem:[%s1077_s4] ss:$0 sm:$0xff] }
  0x1f   : > { %411 = vmatpush1.bf16.msra.mxu0 %v896_v8  ;;  %843 = vmatpush3.bf16.msra.mxu1 %v914_v19 }
  0x20   : > { %412 = vmatprep.subr.bf16.mxu0 %v897_v9  ;;  %844 = vmatprep.subr.bf16.mxu1 %v915_v20 }
  0x23   : > { %413 = vmatpush1.bf16.msra.mxu0 %v899_v11  ;;  %845 = vmatpush3.bf16.msra.mxu1 %v916_v23 }
  0x24   : > { %414 = vmatprep.subr.bf16.mxu0 %v900_v13  ;;  %846 = vmatprep.subr.bf16.mxu1 %v917_v24 }
  0x27   : > { %415 = vmatpush1.bf16.msra.mxu0 %v902_v17  ;;  %847 = vmatpush3.bf16.msra.mxu1 %v918_v28 }
  0x28   : > { %416 = vmatprep.subr.bf16.mxu0 %v903_v18  ;;  %848 = vmatprep.subr.bf16.mxu1 %v919_v29 }
  0x2b   : > { %417 = vmatpush1.bf16.msra.mxu0 %v905_v21  ;;  %849 = vmatpush3.bf16.msra.mxu1 %v920_v31 }
  0x2c   : > { %418 = vmatprep.subr.bf16.mxu0 %v906_v22  ;;  %850 = vmatprep.subr.bf16.mxu1 %v921_v32 }
  0x2f   : > { %419 = vmatpush1.bf16.msra.mxu0 %v908_v25  ;;  %851 = vmatpush3.bf16.msra.mxu1 %v922_v33 }
  0x30   : > { %852 = vmatprep.subr.bf16.mxu1 %v923_v34 }
  0x32   : > { %437 = vmatmul.mubr.bf16.vlgmr.msra.gmra.mrb[0].mxu0 %v307_v30 }
  0x33   : > { %853 = vmatpush3.bf16.msra.mxu1 %v924_v35 }
 0x105   : > { %v438_v36 = vpop.f32.mrb[0].mxu0 }
 0x106   : > { %v440_v37 = vpop.f32.mrb[1].mxu0  ;;  %v447_v39 = vmax.f32 %v438_v36, 0.0 }
 0x107   : > { %v442_v38 = vpop.f32.mrb[2].mxu0  ;;  %v448_v42 = vmax.f32 %v440_v37, 0.0 }
 0x108   : > { %v449_v40 = vmax.f32 %v442_v38, 0.0  ;;  %v444_v41 = vpop.f32.mrb[3].mxu0 }
 0x109   : > { %v450_v43 = vmax.f32 %v444_v41, 0.0 }
 0x10a   : > { %v451_v44 = vpack.c.bf16 %v449_v40, %v447_v39 }
 0x10b   : > { %v452_v45 = vpack.c.bf16 %v450_v43, %v448_v42 }
 0x10d   : > { %613 = vmatprep.mubr.bf16.mxu1 %v452_v45 }
 0x10e   : > { %614 = vmatmul.mubr.bf16.vlgmr.msra.gmra.mrb[0].mxu1 %v451_v44 }
 0x1e1   : > { %v854_v46 = vpop.f32.mrb[0].mxu1 }
 0x1e2   : > { %v855_v47 = vpop.f32.mrb[1].mxu1 }
 0x1e3   : > { %v856_v48 = vadd.f32 %v855_v47, %v854_v46  ;;  %v857_v49 = vpop.f32.mrb[2].mxu1 }
 0x1e4   : > { %v858_v50 = vpop.f32.mrb[3].mxu1 }
 0x1e5   : > { %v616_v51 = vadd.f32 %v856_v48, %v305_v26  ;;  %v859_v52 = vadd.f32 %v858_v50, %v857_v49 }
 0x1e7   : > { %v619_v53 = vadd.f32 %v859_v52, %v306_v27  ;;  %622 = vadd.xlane.f32.xlu0 %v616_v51  ;;  %v628_v54 = vmul.f32 %v616_v51, %v616_v51 }
 0x1e9   : > { %630 = vadd.xlane.f32.xlu1 %v628_v54  ;;  %v629_v55 = vmul.f32 %v619_v53, %v619_v53 }
 0x1eb   : > { %624 = vadd.xlane.f32.xlu0 %v619_v53 }
 0x1ed   : > { %632 = vadd.xlane.f32.xlu1 %v629_v55 }
 0x274   : > { %v623_v56 = vpop.xlane.xlu0 %622 }
 0x275   : > { %v626_v57 = vmul.f32 0.0078125, %v623_v56 }
 0x276   : > { %v631_v58 = vpop.xlane.xlu1 %630 }
 0x277   : > { %v636_v59 = vmul.f32 %v626_v57, %v626_v57  ;;  %v634_v60 = vmul.f32 0.0078125, %v631_v58  ;;  %v646_v8 = vsub.f32 %v616_v51, %v626_v57 }
 0x278   : > { %v625_v61 = vpop.xlane.xlu0 %624 }
 0x279   : > { %v638_v62 = vsub.f32 %v634_v60, %v636_v59  ;;  %v627_v63 = vmul.f32 0.0078125, %v625_v61 }
 0x27a   : > { %v633_v0 = vpop.xlane.xlu1 %632 }
 0x27b   : > { %v640_v1 = vadd.f32 1e-05, %v638_v62  ;;  %v637_v2 = vmul.f32 %v627_v63, %v627_v63  ;;  %v635_v3 = vmul.f32 0.0078125, %v633_v0  ;;  %v647_v14 = vsub.f32 %v619_v53, %v627_v63 }
 0x27d   : > { %925 = vrsqrt.f32 %v640_v1  ;;  %v639_v4 = vsub.f32 %v635_v3, %v637_v2 }
 0x27f   : > { %v641_v5 = vadd.f32 1e-05, %v639_v4 }
 0x281   : > { %927 = vrsqrt.f32 %v641_v5 }
 0x287   : > { %v926_v7 = vpop.eup %925 }
 0x288   : > { %v654_v9 = vmul.f32 %v926_v7, %v830_v6 }
 0x28a   : > { %v656_v11 = vmul.f32 %v654_v9, %v646_v8 }
 0x28b   : > { %v928_v12 = vpop.eup %927 }
 0x28c   : > { %v664_v13 = vadd.f32 %v831_v10, %v656_v11  ;;  %v655_v15 = vmul.f32 %v928_v12, %v830_v6 }
 0x28e   : > { %666 = vst [vmem:[%s302_s14] sm:$0xff] %v664_v13  ;;  %v657_v16 = vmul.f32 %v655_v15, %v647_v14 }
 0x290   : > { %v665_v17 = vadd.f32 %v831_v10, %v657_v16 }
 0x292   : > { %667 = vst [vmem:[%s302_s14 + $0x8] sm:$0xff] %v665_v17 }
 0x293 PF: > { %s15_s20 = sadd.s32 1, %s951_s20   ;;  %s1079_s18 = smov %s947_s19 }
 0x294   : > { %p12_p5 = scmp.ge.s32.totalorder %s15_s20, 6   ;;  %s1080_s19 = smov %s1082_s21 }
 0x296   :  { %14 = sbr.rel (!%p12_p5) target bundleno = 2 (0x2), region = 76 }

</bundles_post_ra>
